<compile_context>
chip_gen: v7x
topology: tpu7x:2x2x1
jax: 0.10.0
libtpu: 0.0.40
codegen_flags: <defaults>
</compile_context>

<pallas_src>
import numpy as np
import jax
import jax.numpy as jnp
from jax.experimental import pallas as pl
from jax.experimental.pallas import tpu as pltpu


def _saf_kernel(x_ref, w_ref, p_ref, o_ref, scores_ref, mean_ref, istd_ref):
    """x_ref: (TB, L, D) VMEM tile, w_ref: (1, D) VMEM,
    p_ref: (3,) SMEM = [linear_bias, bn_gamma, bn_beta],
    o_ref: (TB, D) VMEM output tile,
    scores_ref: (NB, TB, L) persistent VMEM scratch,
    mean_ref / istd_ref: (1, 1) VMEM scratch caching the global BN statistics."""
    phase = pl.program_id(0)
    i = pl.program_id(1)

    lin_bias = p_ref[0]
    bn_gamma = p_ref[1]
    bn_beta = p_ref[2]

    @pl.when(phase == 0)
    def _scores_pass():
        # Per-row Linear score.  The matvec is a negligible fraction of runtime (N=1
        # MXU output), so keep it on the VPU: broadcast-multiply + lane reduce.  The
        # input stays in its native dtype (bf16 ok); accumulation is f32 via promotion.
        x = x_ref[...]                                          # (TB, L, D)
        w = w_ref[...].astype(jnp.float32)                      # (1, D)
        scores = jnp.sum(x * w[None, :, :], axis=-1) + lin_bias  # (TB, L) f32
        scores_ref[i] = scores

    @pl.when(jnp.logical_and(phase == 1, i == 0))
    def _bn_stats():
        # BatchNorm1d(1), training mode: biased stats over all B*L scores, computed
        # ONCE and cached in (1,1) VMEM scratch (stays in vector land — no vreg->sreg
        # extraction) so later phase-1 tiles skip the global reduction.
        all_scores = scores_ref[...]                            # (NB, TB, L) f32, tiny
        mean = jnp.mean(all_scores)
        var = jnp.mean((all_scores - mean) ** 2)
        mean_ref[...] = jnp.reshape(mean, (1, 1))
        istd_ref[...] = jnp.reshape(1.0 / jnp.sqrt(var + 1e-5), (1, 1))

    @pl.when(phase == 1)
    def _output_pass():
        x = x_ref[...]                                          # (TB, L, D) native dtype

        s = scores_ref[i]                                       # (TB, L) f32
        s = (s - mean_ref[...]) * (istd_ref[...] * bn_gamma) + bn_beta

        # sigmoid + l1norm over L (sigmoid output >= 0, so the reference abs() is a no-op).
        sig = jax.nn.sigmoid(s)
        attn = sig / (jnp.sum(sig, axis=-1, keepdims=True) + 1e-8)   # (TB, L) f32

        # Attention-weighted sum over L on the VPU.  The batched einsum form lowers to
        # TB independent M=1 matmuls (1/8 sublane feed + per-call result-FIFO drain on
        # v5e/v6e); broadcast-multiply + sublane reduce is mem-bound either way and
        # keeps f32 accumulation even for bf16 inputs.
        saf = jnp.sum(attn[:, :, None] * x, axis=1)             # (TB, D) f32

        # l2norm over D (eps added to the norm, matching the reference).
        norm = jnp.sqrt(jnp.sum(saf * saf, axis=-1, keepdims=True)) + 1e-8
        o_ref[...] = (saf / norm).astype(o_ref.dtype)


def _vmem_limit_bytes():
    """Generation-aware VMEM limit: 3/4 of physical VMEM (128 MiB on v5e/v6e, 64 MiB
    per TC on v7x), capped at 100 MiB; conservative 48 MiB if the query fails."""
    physical = 64 * 1024 * 1024
    try:
        physical = int(pltpu.get_tpu_info().vmem_capacity_bytes)
    except Exception:
        pass
    return max(32 * 1024 * 1024, min(physical * 3 // 4, 100 * 1024 * 1024))


def _pick_batch_tile(B, L, D, itemsize, budget_bytes):
    """Largest batch tile fitting the VMEM budget.  Prefers TB == B (single HBM fetch
    of sim_emb across both phases); otherwise the largest multiple-of-8 divisor of B
    (the (TB, D) output block needs TB % 8 == 0 or TB == B)."""
    scores_bytes = B * L * 4 + 2 * 8 * 128 * 4          # score scratch + padded stats

    def fits(tb, nbuf):
        x_bytes = nbuf * tb * L * D * itemsize           # pipelined input buffers
        out_bytes = 2 * tb * D * 4                       # double-buffered f32 output
        interm_bytes = tb * L * D * 4                     # f32 product (conservative)
        return x_bytes + out_bytes + interm_bytes + scores_bytes <= budget_bytes

    if fits(B, 2):
        return B                                          # resident: x fetched once
    best = None
    for tb in range(8, B, 8):
        if B % tb == 0 and fits(tb, 3):                   # triple-buffered stream
            best = tb
    if best is not None:
        return best
    for tb in range(8, B, 8):
        if B % tb == 0:
            return tb                                     # smallest legal tile
    # TODO(synk): pad B to a multiple of 8 and mask padded rows out of the BN stats /
    # l1 sums when B has no multiple-of-8 divisor; falling back to a single block.
    return B


def attention_filtration(sim_emb, attn_w, attn_b, bn_gamma, bn_beta):
    """sim_emb: (B, L, D) f32/bf16; attn_w: (1, D); attn_b, bn_gamma, bn_beta: scalars."""
    B, L, D = sim_emb.shape
    params = jnp.stack([jnp.asarray(attn_b, jnp.float32),
                        jnp.asarray(bn_gamma, jnp.float32),
                        jnp.asarray(bn_beta, jnp.float32)])   # (3,) -> SMEM

    vmem_limit = _vmem_limit_bytes()
    TB = _pick_batch_tile(B, L, D, jnp.dtype(sim_emb.dtype).itemsize,
                          budget_bytes=(vmem_limit * 4) // 5)
    NB = B // TB

    if NB > 1:
        # Streaming case: triple-buffer the input tiles (per-tile compute is short
        # relative to the tile DMA in this mem-bound kernel).
        x_spec = pl.BlockSpec((TB, L, D), lambda p, i: (i, 0, 0),
                              pipeline_mode=pl.Buffered(3))
    else:
        # TB == B: block index is (0,0,0) for every grid step -> x is DMA'd from HBM
        # exactly once and stays resident through both phases.
        x_spec = pl.BlockSpec((TB, L, D), lambda p, i: (i, 0, 0))

    return pl.pallas_call(
        _saf_kernel,
        out_shape=jax.ShapeDtypeStruct((B, D), jnp.float32),
        grid=(2, NB),
        in_specs=[
            x_spec,
            pl.BlockSpec((1, D), lambda p, i: (0, 0)),
            pl.BlockSpec(memory_space=pltpu.MemorySpace.SMEM),
        ],
        # Output index p*i keeps block 0 resident (and unwritten) through all of phase
        # 0 so no garbage is flushed to HBM; each phase-1 tile fully overwrites its
        # block before the index change triggers writeback.  Fragile-but-correct under
        # current writeback-on-index-change semantics — do not change without revisiting.
        out_specs=pl.BlockSpec((TB, D), lambda p, i: (p * i, 0)),
        scratch_shapes=[
            pltpu.VMEM((NB, TB, L), jnp.float32),   # per-row Linear scores
            pltpu.VMEM((1, 1), jnp.float32),        # cached BN mean
            pltpu.VMEM((1, 1), jnp.float32),        # cached BN 1/std
        ],
        compiler_params=pltpu.CompilerParams(
            # TODO(synk): v7x dual-TensorCore split of the batch axis (partial BN sums
            # combined via CMEM + core_barrier) left as future work.
            dimension_semantics=("arbitrary", "arbitrary"),
            vmem_limit_bytes=vmem_limit,
        ),
    )(sim_emb, attn_w, params)


def reference(sim_emb, attn_w, attn_b, bn_gamma, bn_beta):
    """Pure-JAX reference mirroring the PyTorch forward (training-mode BN)."""
    sim_emb = sim_emb.astype(jnp.float32)
    scores = jnp.einsum("bld,d->bl", sim_emb, attn_w[0].astype(jnp.float32)) + attn_b
    mean = jnp.mean(scores)
    var = jnp.mean((scores - mean) ** 2)
    s = (scores - mean) / jnp.sqrt(var + 1e-5) * bn_gamma + bn_beta
    sig = jax.nn.sigmoid(s)
    attn = sig / (jnp.sum(jnp.abs(sig), axis=-1, keepdims=True) + 1e-8)
    saf = jnp.einsum("bl,bld->bd", attn, sim_emb)
    return saf / (jnp.sqrt(jnp.sum(saf * saf, axis=-1, keepdims=True)) + 1e-8)


if __name__ == "__main__":
    B, L, D = 2, 8, 32   # batch, L+1 alignments, sim_dim

    key = jax.random.PRNGKey(0)
    k_x, k_w = jax.random.split(key)

    sim_emb = jax.random.normal(k_x, (B, L, D), dtype=jnp.float32)

    # Deterministic init matching AttentionFiltration.init_weights():
    #   Linear(D, 1): weight ~ U(-r, r), r = sqrt(6)/sqrt(D + 1); bias = 0
    #   BatchNorm1d(1): weight = 1, bias = 0
    r = float(np.sqrt(6.0) / np.sqrt(D + 1))
    attn_w = jax.random.uniform(k_w, (1, D), minval=-r, maxval=r, dtype=jnp.float32)
    attn_b = jnp.float32(0.0)
    bn_gamma = jnp.float32(1.0)
    bn_beta = jnp.float32(0.0)

    out = attention_filtration(sim_emb, attn_w, attn_b, bn_gamma, bn_beta)
    out = jax.block_until_ready(out)

    ref = reference(sim_emb, attn_w, attn_b, bn_gamma, bn_beta)
    assert out.shape == (B, D)
    assert np.allclose(np.asarray(out), np.asarray(ref), atol=1e-5, rtol=1e-5)

    print("KERNEL_OK")
</pallas_src>

<mosaic_0001>
module attributes {stable_mosaic.version = 11 : i64} {
  func.func @_saf_kernel(%arg0: i32, %arg1: i32, %arg2: memref<2x8x32xf32, #tpu.memory_space<vmem>>, %arg3: memref<1x32xf32, #tpu.memory_space<vmem>>, %arg4: memref<3xf32, #tpu.memory_space<smem>>, %arg5: memref<2x32xf32, #tpu.memory_space<vmem>>, %arg6: memref<1x2x8xf32, #tpu.memory_space<vmem>>, %arg7: memref<1x1xf32, #tpu.memory_space<vmem>>, %arg8: memref<1x1xf32, #tpu.memory_space<vmem>>) attributes {dimension_semantics = [#tpu.dimension_semantics<arbitrary>, #tpu.dimension_semantics<arbitrary>], iteration_bounds = array<i64: 2, 1>, scalar_prefetch = 0 : i64, scratch_operands = 3 : i64, tpu.core_type = #tpu.core_type<tc>, window_params = [{transform_indices = @transform_0, window_bounds = array<i64: 2, 8, 32>}, {pipeline_mode = #tpu.pipeline_mode<synchronous>, transform_indices = @transform_1, window_bounds = array<i64: 1, 32>}, {transform_indices = @transform_2, window_bounds = array<i64: 3>}, {transform_indices = @transform_3, window_bounds = array<i64: 2, 32>}]} {
    %c0 = arith.constant 0 : index
    %0 = memref.load %arg4[%c0] : memref<3xf32, #tpu.memory_space<smem>>
    %c1 = arith.constant 1 : index
    %1 = memref.load %arg4[%c1] : memref<3xf32, #tpu.memory_space<smem>>
    %c2 = arith.constant 2 : index
    %2 = memref.load %arg4[%c2] : memref<3xf32, #tpu.memory_space<smem>>
    %c0_i32 = arith.constant 0 : i32
    %3 = arith.cmpi eq, %arg0, %c0_i32 : i32
    %4 = arith.extui %3 : i1 to i32
    %c0_i32_0 = arith.constant 0 : i32
    %5 = arith.cmpi ne, %4, %c0_i32_0 : i32
    scf.if %5 {
      %c0_5 = arith.constant 0 : index
      %c0_6 = arith.constant 0 : index
      %c0_7 = arith.constant 0 : index
      %14 = vector.load %arg2[%c0_5, %c0_6, %c0_7] : memref<2x8x32xf32, #tpu.memory_space<vmem>>, vector<2x8x32xf32>
      %c0_8 = arith.constant 0 : index
      %c0_9 = arith.constant 0 : index
      %15 = vector.load %arg3[%c0_8, %c0_9] : memref<1x32xf32, #tpu.memory_space<vmem>>, vector<1x32xf32>
      %16 = vector.shape_cast %15 : vector<1x32xf32> to vector<1x1x32xf32>
      %17 = vector.broadcast %16 : vector<1x1x32xf32> to vector<2x8x32xf32>
      %18 = arith.mulf %14, %17 : vector<2x8x32xf32>
      %cst = arith.constant dense<0.000000e+00> : vector<2x8xf32>
      %19 = vector.multi_reduction <add>, %18, %cst [2] : vector<2x8x32xf32> to vector<2x8xf32>
      %20 = vector.broadcast %0 : f32 to vector<2x8xf32>
      %21 = arith.addf %19, %20 : vector<2x8xf32>
      %22 = arith.index_cast %arg1 : i32 to index
      %c0_10 = arith.constant 0 : index
      %c0_11 = arith.constant 0 : index
      %23 = vector.load %arg6[%22, %c0_10, %c0_11] : memref<1x2x8xf32, #tpu.memory_space<vmem>>, vector<1x2x8xf32>
      %24 = vector.shape_cast %23 : vector<1x2x8xf32> to vector<2x8xf32>
      %25 = vector.shape_cast %21 : vector<2x8xf32> to vector<1x2x8xf32>
      tpu.vector_store %arg6[%22, %c0_10, %c0_11], %25 {strides = array<i32>} : memref<1x2x8xf32, #tpu.memory_space<vmem>>, vector<1x2x8xf32>,
    } else {
    }
    %c1_i32 = arith.constant 1 : i32
    %6 = arith.cmpi eq, %arg0, %c1_i32 : i32
    %c0_i32_1 = arith.constant 0 : i32
    %7 = arith.cmpi eq, %arg1, %c0_i32_1 : i32
    %8 = arith.andi %6, %7 : i1
    %9 = arith.extui %8 : i1 to i32
    %c0_i32_2 = arith.constant 0 : i32
    %10 = arith.cmpi ne, %9, %c0_i32_2 : i32
    scf.if %10 {
      %c0_5 = arith.constant 0 : index
      %c0_6 = arith.constant 0 : index
      %c0_7 = arith.constant 0 : index
      %14 = vector.load %arg6[%c0_5, %c0_6, %c0_7] : memref<1x2x8xf32, #tpu.memory_space<vmem>>, vector<1x2x8xf32>
      %15 = vector.shape_cast %14 : vector<1x2x8xf32> to vector<1x1x2x8xf32>
      %cst = arith.constant dense<0.000000e+00> : vector<1xf32>
      %16 = vector.multi_reduction <add>, %15, %cst [1, 2, 3] : vector<1x1x2x8xf32> to vector<1xf32>
      %17 = vector.shape_cast %16 : vector<1xf32> to vector<1x1x1x1xf32>
      %18 = vector.extract %17[0, 0, 0, 0] : f32 from vector<1x1x1x1xf32>
      %cst_8 = arith.constant 1.600000e+01 : f32
      %19 = arith.divf %18, %cst_8 : f32
      %20 = vector.broadcast %19 : f32 to vector<1x2x8xf32>
      %21 = arith.subf %14, %20 : vector<1x2x8xf32>
      %22 = arith.mulf %21, %21 : vector<1x2x8xf32>
      %23 = vector.shape_cast %22 : vector<1x2x8xf32> to vector<1x1x2x8xf32>
      %cst_9 = arith.constant dense<0.000000e+00> : vector<1xf32>
      %24 = vector.multi_reduction <add>, %23, %cst_9 [1, 2, 3] : vector<1x1x2x8xf32> to vector<1xf32>
      %25 = vector.shape_cast %24 : vector<1xf32> to vector<1x1x1x1xf32>
      %26 = vector.extract %25[0, 0, 0, 0] : f32 from vector<1x1x1x1xf32>
      %cst_10 = arith.constant 1.600000e+01 : f32
      %27 = arith.divf %26, %cst_10 : f32
      %28 = vector.broadcast %19 : f32 to vector<1x1xf32>
      %c0_11 = arith.constant 0 : index
      %c0_12 = arith.constant 0 : index
      %29 = vector.load %arg7[%c0_11, %c0_12] : memref<1x1xf32, #tpu.memory_space<vmem>>, vector<1x1xf32>
      tpu.vector_store %arg7[%c0_11, %c0_12], %28 {strides = array<i32>} : memref<1x1xf32, #tpu.memory_space<vmem>>, vector<1x1xf32>,
      %cst_13 = arith.constant 9.99999974E-6 : f32
      %30 = arith.addf %27, %cst_13 : f32
      %31 = math.sqrt %30 : f32
      %cst_14 = arith.constant 1.000000e+00 : f32
      %32 = arith.divf %cst_14, %31 : f32
      %33 = vector.broadcast %32 : f32 to vector<1x1xf32>
      %c0_15 = arith.constant 0 : index
      %c0_16 = arith.constant 0 : index
      %34 = vector.load %arg8[%c0_15, %c0_16] : memref<1x1xf32, #tpu.memory_space<vmem>>, vector<1x1xf32>
      tpu.vector_store %arg8[%c0_15, %c0_16], %33 {strides = array<i32>} : memref<1x1xf32, #tpu.memory_space<vmem>>, vector<1x1xf32>,
    } else {
    }
    %c1_i32_3 = arith.constant 1 : i32
    %11 = arith.cmpi eq, %arg0, %c1_i32_3 : i32
    %12 = arith.extui %11 : i1 to i32
    %c0_i32_4 = arith.constant 0 : i32
    %13 = arith.cmpi ne, %12, %c0_i32_4 : i32
    scf.if %13 {
      %c0_5 = arith.constant 0 : index
      %c0_6 = arith.constant 0 : index
      %c0_7 = arith.constant 0 : index
      %14 = vector.load %arg2[%c0_5, %c0_6, %c0_7] : memref<2x8x32xf32, #tpu.memory_space<vmem>>, vector<2x8x32xf32>
      %15 = arith.index_cast %arg1 : i32 to index
      %c0_8 = arith.constant 0 : index
      %c0_9 = arith.constant 0 : index
      %16 = vector.load %arg6[%15, %c0_8, %c0_9] : memref<1x2x8xf32, #tpu.memory_space<vmem>>, vector<1x2x8xf32>
      %17 = vector.shape_cast %16 : vector<1x2x8xf32> to vector<2x8xf32>
      %c0_10 = arith.constant 0 : index
      %c0_11 = arith.constant 0 : index
      %18 = vector.load %arg7[%c0_10, %c0_11] : memref<1x1xf32, #tpu.memory_space<vmem>>, vector<1x1xf32>
      %19 = vector.broadcast %18 : vector<1x1xf32> to vector<2x8xf32>
      %20 = arith.subf %17, %19 : vector<2x8xf32>
      %c0_12 = arith.constant 0 : index
      %c0_13 = arith.constant 0 : index
      %21 = vector.load %arg8[%c0_12, %c0_13] : memref<1x1xf32, #tpu.memory_space<vmem>>, vector<1x1xf32>
      %22 = vector.broadcast %1 : f32 to vector<1x1xf32>
      %23 = arith.mulf %21, %22 : vector<1x1xf32>
      %24 = vector.broadcast %23 : vector<1x1xf32> to vector<2x8xf32>
      %25 = arith.mulf %20, %24 : vector<2x8xf32>
      %26 = vector.broadcast %2 : f32 to vector<2x8xf32>
      %27 = arith.addf %25, %26 : vector<2x8xf32>
      %28 = arith.negf %27 : vector<2x8xf32>
      %29 = math.exp %28 : vector<2x8xf32>
      %cst = arith.constant 1.000000e+00 : f32
      %30 = vector.broadcast %cst : f32 to vector<2x8xf32>
      %31 = arith.addf %30, %29 : vector<2x8xf32>
      %32 = arith.divf %30, %31 : vector<2x8xf32>
      %cst_14 = arith.constant dense<0.000000e+00> : vector<2xf32>
      %33 = vector.multi_reduction <add>, %32, %cst_14 [1] : vector<2x8xf32> to vector<2xf32>
      %34 = vector.shape_cast %33 : vector<2xf32> to vector<2x1xf32>
      %cst_15 = arith.constant 9.99999993E-9 : f32
      %35 = vector.broadcast %cst_15 : f32 to vector<2x1xf32>
      %36 = arith.addf %34, %35 : vector<2x1xf32>
      %37 = vector.broadcast %36 : vector<2x1xf32> to vector<2x8xf32>
      %38 = arith.divf %32, %37 : vector<2x8xf32>
      %39 = vector.shape_cast %38 : vector<2x8xf32> to vector<2x8x1xf32>
      %40 = vector.broadcast %39 : vector<2x8x1xf32> to vector<2x8x32xf32>
      %41 = arith.mulf %40, %14 : vector<2x8x32xf32>
      %cst_16 = arith.constant dense<0.000000e+00> : vector<2x32xf32>
      %42 = vector.multi_reduction <add>, %41, %cst_16 [1] : vector<2x8x32xf32> to vector<2x32xf32>
      %43 = arith.mulf %42, %42 : vector<2x32xf32>
      %cst_17 = arith.constant dense<0.000000e+00> : vector<2xf32>
      %44 = vector.multi_reduction <add>, %43, %cst_17 [1] : vector<2x32xf32> to vector<2xf32>
      %45 = vector.shape_cast %44 : vector<2xf32> to vector<2x1xf32>
      %46 = math.sqrt %45 : vector<2x1xf32>
      %cst_18 = arith.constant 9.99999993E-9 : f32
      %47 = vector.broadcast %cst_18 : f32 to vector<2x1xf32>
      %48 = arith.addf %46, %47 : vector<2x1xf32>
      %49 = vector.broadcast %48 : vector<2x1xf32> to vector<2x32xf32>
      %50 = arith.divf %42, %49 : vector<2x32xf32>
      %c0_19 = arith.constant 0 : index
      %c0_20 = arith.constant 0 : index
      %51 = vector.load %arg5[%c0_19, %c0_20] : memref<2x32xf32, #tpu.memory_space<vmem>>, vector<2x32xf32>
      tpu.vector_store %arg5[%c0_19, %c0_20], %50 {strides = array<i32>} : memref<2x32xf32, #tpu.memory_space<vmem>>, vector<2x32xf32>,
    } else {
    }
    return
  }
  func.func @transform_0(%arg0: i32, %arg1: i32) -> (i32, i32, i32) {
    %c0_i32 = arith.constant 0 : i32
    %c0_i32_0 = arith.constant 0 : i32
    %c0_i32_1 = arith.constant 0 : i32
    return %arg1, %c0_i32, %c0_i32_0 : i32, i32, i32
  }
  func.func @transform_1(%arg0: i32, %arg1: i32) -> (i32, i32) {
    %c0_i32 = arith.constant 0 : i32
    %c0_i32_0 = arith.constant 0 : i32
    %c0_i32_1 = arith.constant 0 : i32
    return %c0_i32, %c0_i32_0 : i32, i32
  }
  func.func @transform_2(%arg0: i32, %arg1: i32) -> i32 {
    %c0_i32 = arith.constant 0 : i32
    %c0_i32_0 = arith.constant 0 : i32
    return %c0_i32 : i32
  }
  func.func @transform_3(%arg0: i32, %arg1: i32) -> (i32, i32) {
    %0 = arith.muli %arg0, %arg1 : i32
    %c0_i32 = arith.constant 0 : i32
    %c0_i32_0 = arith.constant 0 : i32
    return %0, %c0_i32 : i32, i32
  }
}

</mosaic_0001>

<bundles_post_ra>
// kernel: tpu_custom_call.1
= control target key start
LH: loop header
LB: loop body
LE: loop exit
PB: predicated region body
PF: predicated region fallthrough
CT: control target
= control target key end

     0   :  { %8 = vsyncpa [#allocation6], 0  ;;  %s894_s0 = inlined_call_operand.hbm [shape: f32[2,8,32], index: 0, kind: input, shape index: {}]   ;;  %s895_s1 = inlined_call_operand.vmem [shape: f32[1,32], index: 1, kind: input, shape index: {}]   ;;  %s896_s2 = inlined_call_operand.vmem [shape: f32[3], index: 2, kind: input, shape index: {}]   ;;  %s897_s3 = inlined_call_operand.hbm [shape: f32[2,32], index: 3, kind: output, shape index: {}]  }
   0x1   :  { %9 = vsyncpa [#allocation8], 0 }
   0x2   :  { %10 = vsyncpa [#allocation7], 0 }
   0x3   :  { %12 = vsyncpa [#allocation7 + $0x1], 0  ;;  %s751_s12 = smov 0   ;;  %s753_s13 = smov 0  }
   0x4   :  { %s755_s14 = smov 0  }
   0x5 LB: > { %s514_s15 = sadd.s32 4294967295, %s723_s14   ;;  %s515_s16 = sadd.s32 4294967294, %s723_s14   ;;  %s723_s14 = sphi %s755_s14, %s18_s14   ;;  %s719_s13 = sphi %s753_s13, %s908_s13   ;;  %s715_s12 = sphi %s751_s12, %s907_s12  }
   0x6   : > { %s30_s17 = sadd.s32 1, %s719_s13  ;;  %p516_p0 = scmp.ge.s32.totalorder %s723_s14, 1 }
   0x7   : > { %p32_p1 = scmp.ge.s32.totalorder %s30_s17, 2  ;;  %p131_p2 = scmp.lt.s32.totalorder %s723_s14, 3 }
   0x8   : > { %p773_p3 = scmp.eq.s32.totalorder %s514_s15, 0  ;;  %s725_s20 = smov [#allocation5]  }
   0x9   : > { %s910_s17 = smov (%p32_p1, %s30_s17), 0  ;;  %p779_p4 = pnand %p516_p0, %p131_p2 }
   0xa   : > { %s901_s18 = scalar_select %p773_p3, 1, 0 }
   0xb   : > { %s902_s19 = scalar_select %p779_p4, 1, 0 }
   0xc   : > { %s146_s21 = sshll.u32 %s725_s20, 4  ;;  %p555_p5 = pneg %p779_p4  ;;  %s147_s21 = int_to_ptr.vmem [resolvable:$true] %s146_s21 }
   0xd   : > { %s163_s24 = sshll.u32 %s896_s2, 4  ;;  %s620_s28 = scalar_lea.hbm %s894_s0, 256  ;;  %s794_s24 = int_to_ptr.vmem [resolvable:$true] %s163_s24 }
   0xe   : > { %p790_p6 = pnand %p773_p3, %p555_p5  ;;  %p621_p7 = scmp.ne.s32.totalorder %s894_s0, %s620_s28 }
   0xf   : > { %p627_p11 = scmp.lt.u32.totalorder %s620_s28, %s894_s0 }
  0x10   : > { %p622_p8 = pneg %p790_p6 }
  0x12   : > { %p623_p9 = pnand %p622_p8, %p621_p7 }
  0x14   : > { %p624_p10 = pneg %p623_p9 }
  0x16   : > { %p629_p12 = pnand %p627_p11, %p624_p10 }
  0x18   : > { %632 = shalt.err (!%p629_p12)
}
  0x19   : > { %s633_s6 = scalar_lea.vmem %s147_s21, 256  ;;  %p641_p2 = scmp.lt.s32.totalorder %s147_s21, %s147_s21 }
  0x1a   : > { %p634_p13 = scmp.ne.s32.totalorder %s147_s21, %s633_s6  ;;  %p642_p5 = scmp.lt.s32.totalorder %s633_s6, %s633_s6 }
  0x1c   : > { %p636_p0 = pnand %p634_p13, %p622_p8  ;;  %p643_p3 = por %p642_p5, %p641_p2 }
  0x1e   : > { %p637_p1 = pneg %p636_p0 }
  0x20   : > { %p644_p4 = pnand %p643_p3, %p637_p1 }
  0x22   : > { %647 = shalt.err (!%p644_p4)
}
  0x23   : > { %s726_s7 = smov 128   ;;  %s727_s8 = smov 8  }
  0x24   : > { %558 = dma.hbm_to_vmem [thread:$0]  (!%p790_p6), %s894_s0, 256, %s147_s21, [#allocation6], %s726_s7, %s726_s7, %s727_s8  }
  0x25   : > { %s648_s11 = scalar_lea.vmem %s794_s24, 16  ;;  %p656_p3 = scmp.lt.s32.totalorder %s794_s24, %s794_s24 }
  0x26   : > { %p649_p7 = scmp.ne.s32.totalorder %s794_s24, %s648_s11  ;;  %p657_p4 = scmp.lt.s32.totalorder %s648_s11, %s648_s11 }
  0x28   : > { %p651_p9 = pnand %p649_p7, %p622_p8  ;;  %p658_p11 = por %p657_p4, %p656_p3 }
  0x2a   : > { %p652_p10 = pneg %p651_p9 }
  0x2c   : > { %p659_p12 = pnand %p658_p11, %p652_p10 }
  0x2e   : > { %662 = shalt.err (!%p659_p12)
}
  0x2f   : > { %s728_s20 = smov [#allocation9]   ;;  %p904_p13 = scmp.ne.s32.totalorder %s902_s19, 0 }
  0x30   : > { %561 = dma.vmem_to_smem (!%p790_p6), %s794_s24, 16, %s728_s20, [#allocation8]  }
  0x31   : > { %176 = sbr.rel (%p904_p13) target bundleno = 1441 (0x5a1), region = 32  ;;  %p905_p0 = scmp.ne.s32.totalorder (!%p904_p13), %s901_s18, 0 }
  0x38   : > { %702 = dma.done.wait (%p905_p0), [#allocation6], 256  }
  0x39   : > { %704 = vsyncadd (%p905_p0), [#allocation6], 4294967040 }
  0x3a   : > { %706 = dma.done.wait (%p905_p0), [#allocation8], 16  }
  0x3b   : > { %708 = vsyncadd (%p905_p0), [#allocation8], 4294967280 }
  0x3c   : > { %186 = sfence }
  0x3d   : > { %s202_s21 = sld [smem:[#allocation9]]  ;;  %s838_s22 = sld [smem:[#allocation9 + $0x1]] }
  0x3e   : > { %s840_s23 = sld [smem:[#allocation9 + $0x2]]  ;;  %p524_p6 = scmp.ne.s32.totalorder %s715_s12, 0 }
  0x3f   : > { %v209_v0 = vld [vmem:[#allocation5] sm:$0xff] (!%p524_p6)  ;;  %v525_v1 = vld [vmem:[%s895_s1] ss:$0 sm:$0xff] (!%p524_p6)  ;;  %vm220_vm0 = vcmask (!%p524_p6), 261120   ;;  %v210_v2 = vld [vmem:[#allocation5 + $0x8] sm:$0xff] (!%p524_p6)  ;;  %v232_v7 = vlaneseq (!%p524_p6)  ;;  %vm242_vm1 = vcmask (!%p524_p6), 1041409  }
  0x40   : > { %208 = sbr.rel (%p524_p6) target bundleno = 219 (0xdb), region = 44  ;;  %v218_v3 = vmul.f32 (!%p524_p6), %v525_v1, %v209_v0  ;;  %v219_v4 = vmul.f32 (!%p524_p6), %v525_v1, %v210_v2  ;;  %vm247_vm2 = vcmask (!%p524_p6), 58368  }
  0x41   : > { %v233_v8 = vand.u32 (!%p524_p6), 127, %v232_v7  ;;  %v235_v9 = vshrl.u32 (!%p524_p6), %v232_v7, 7 }
  0x42   : > { %v221_v5 = vsel (!%p524_p6), %vm220_vm0, %v218_v3, 0.0  ;;  %v224_v6 = vsel (!%p524_p6), %vm220_vm0, %v219_v4, 0.0 }
  0x43   : > { %222 = vadd.xlane.f32.xlu0 (!%p524_p6), %v221_v5  ;;  %v227_v10 = vstv (!%p524_p6), %s202_s21  ;;  %v236_v12 = vsub.s32 (!%p524_p6), %v233_v8, %v235_v9 }
  0x47   : > { %225 = vadd.xlane.f32.xlu0 %v224_v6 }
  0xd0   : > { %v223_v11 = vpop.xlane.xlu0 %222 }
  0xd1   : > { %v228_v13 = vadd.f32 %v227_v10, %v223_v11 }
  0xd3   : > { %v237_v16 = vrot.slane %v228_v13, %v236_v12 }
  0xd4   : > { %v226_v14 = vpop.xlane.xlu0 %225 }
  0xd5   : > { %v229_v15 = vadd.f32 %v227_v10, %v226_v14 }
  0xd7   : > { %v241_v17 = vrot.slane %v229_v15, %v236_v12 }
  0xd9   : > { %v243_v18 = vsel %vm242_vm1, %v241_v17, %v237_v16 }
  0xda   : > { %248 = vst.msk [vmem:[#allocation2] sm:$0x3] %vm247_vm2, %v243_v18 }
  0xdb PF: > { %p249_p8 = scmp.eq.s32.totalorder %s715_s12, 1 }
  0xdc   : > { %vm256_vm3 = vcmask (%p249_p8), 58368   ;;  %vm286_vm4 = vcmask (%p249_p8), 0  }
  0xdd   : > { %254 = sbr.rel (!%p249_p8) target bundleno = 777 (0x309), region = 48 }
  0xe1   : > { %v255_v19 = vld [vmem:[#allocation2] sm:$0x3] (%p249_p8) }
  0xe2   : > { %v257_v20 = vsel (%p249_p8), %vm256_vm3, %v255_v19, 0.0 }
  0xe3   : > { %258 = vadd.xlane.f32.xlu0 (%p249_p8), %v257_v20 }
 0x170   : > { %v259_v21 = vpop.xlane.xlu0 %258 }
 0x171   : > { %v260_v22 = vrot.slane %v259_v21, 4 }
 0x173   : > { %v261_v23 = vadd.f32 %v260_v22, %v259_v21 }
 0x175   : > { %v262_v24 = vrot.slane %v261_v23, 2 }
 0x177   : > { %v263_v25 = vadd.f32 %v262_v24, %v261_v23 }
 0x179   : > { %v264_v26 = vrot.slane %v263_v25, 1 }
 0x17b   : > { %v265_v27 = vadd.f32 %v264_v26, %v263_v25 }
 0x17d   : > { %535 = vpush %v265_v27 }
 0x1ae   : > { %s536_s18 = spop %535 }
 0x1af   : > { %s269_s25 = smul.f32 0.0625, %s536_s18 }
 0x1b1   : > { %v270_v28 = vstv %s269_s25 }
 0x1b2   : > { %v271_v29 = vsub.f32 %v255_v19, %v270_v28  ;;  %287 = vst.msk [vmem:[#allocation3] sm:$0x1] %vm286_vm4, %v270_v28 }
 0x1b4   : > { %v272_v30 = vmul.f32 %v271_v29, %v271_v29 }
 0x1b6   : > { %v273_v31 = vsel %vm256_vm3, %v272_v30, 0.0 }
 0x1b7   : > { %274 = vadd.xlane.f32.xlu0 %v273_v31 }
 0x244   : > { %v275_v32 = vpop.xlane.xlu0 %274 }
 0x245   : > { %v276_v33 = vrot.slane %v275_v32, 4 }
 0x247   : > { %v277_v34 = vadd.f32 %v276_v33, %v275_v32 }
 0x249   : > { %v278_v35 = vrot.slane %v277_v34, 2 }
 0x24b   : > { %v279_v36 = vadd.f32 %v278_v35, %v277_v34 }
 0x24d   : > { %v280_v37 = vrot.slane %v279_v36, 1 }
 0x24f   : > { %v281_v38 = vadd.f32 %v280_v37, %v279_v36 }
 0x251   : > { %537 = vpush %v281_v38 }
 0x282   : > { %s538_s26 = spop %537 }
 0x283   : > { %s285_s27 = smul.f32 0.0625, %s538_s26 }
 0x285   : > { %s288_s28 = sadd.f32 1e-05, %s285_s27 }
 0x287   : > { %v289_v39 = vstv %s288_s28 }
 0x288   : > { %603 = vrsqrt.f32 %v289_v39  ;;  %vm292_vm5 = vcmp.eq.f32.partialorder %v289_v39, inf  ;;  %v295_v42 = vand.u32 2147483648, %v289_v39  ;;  %vm294_vm6 = vcmp.eq.f32.partialorder %v289_v39, 0.0 }
 0x292   : > { %v604_v40 = vpop.eup %603 }
 0x293   : > { %v291_v41 = vmul.f32 %v604_v40, %v289_v39 }
 0x295   : > { %v293_v43 = vsel %vm292_vm5, %v289_v39, %v291_v41 }
 0x296   : > { %v296_v44 = vsel %vm294_vm6, %v295_v42, %v293_v43 }
 0x297   : > { %539 = vpush %v296_v44 }
 0x2c8   : > { %s540_s29 = spop %539 }
 0x2c9   : > { %v298_v45 = vstv %s540_s29 }
 0x2ca   : > { %605 = vrcp.f32 %v298_v45 }
 0x2d4   : > { %v606_v46 = vpop.eup %605 }
 0x2d5   : > { %541 = vpush %v606_v46 }
 0x306   : > { %s542_s30 = spop %541 }
 0x307   : > { %v301_v47 = vstv %s542_s30 }
 0x308   : > { %302 = vst.msk [vmem:[#allocation4] sm:$0x1] %vm286_vm4, %v301_v47 }
 0x309 PF: > { %p527_p1 = scmp.ne.s32.totalorder %s715_s12, 1 }
 0x30a   : > { %v528_v48 = vld [vmem:[#allocation3] ss:$0 sm:$0xff] (!%p527_p1)  ;;  %v323_v50 = vstv (!%p527_p1), %s838_s22  ;;  %v326_v51 = vlaneseq (!%p527_p1)  ;;  %v729_v52 = vmov (!%p527_p1), 0   ;;  %v310_v58 = vld [vmem:[#allocation2] sm:$0x3] (!%p527_p1)  ;;  %v335_v60 = vstv (!%p527_p1), %s840_s23  ;;  %v307_v12 = vld [vmem:[#allocation5 + $0x8] sm:$0xff] (!%p527_p1) }
 0x30b   : > { %305 = sbr.rel (%p527_p1) target bundleno = 1418 (0x58a), region = 52  ;;  %607 = vset.pattern.permute.xlu0 (!%p527_p1), %v729_v52  ;;  %vm343_vm7 = vcmask (!%p527_p1), 58368   ;;  %v306_v13 = vld [vmem:[#allocation5] sm:$0xff] (!%p527_p1)  ;;  %vm366_vm8 = vcmask (!%p527_p1), 261120   ;;  %vm385_vm9 = vcmask (!%p527_p1), 1041409   ;;  %vm388_vm10 = vcmask (!%p527_p1), 254976  }
 0x30c   : > { %318 = vperm.xlu0 (!%p527_p1), %607, %v528_v48   ;;  %v327_v54 = vshrl.u32 (!%p527_p1), %v326_v51, 7 }
 0x30e   : > { %v328_v55 = vsub.s32 (!%p527_p1), 0, %v327_v54  ;;  %v359_v7 = vsub.s32 (!%p527_p1), 1, %v327_v54 }
 0x30f   : > { %v322_v49 = vld [vmem:[#allocation4] sm:$0x1] (!%p527_p1) }
 0x310   : > { %v324_v53 = vmul.f32 (!%p527_p1), %v323_v50, %v322_v49 }
 0x312   : > { %v329_v56 = vrot.slane %v324_v53, %v328_v55 }
 0x314   : > { %331 = vperm.xlu0 %607, %v329_v56  }
 0x38b   : > { %v319_v57 = vpop.permute.xlu0 %318 }
 0x38c   : > { %v321_v59 = vsub.f32 %v310_v58, %v319_v57 }
 0x393   : > { %v332_v61 = vpop.permute.xlu0 %331 }
 0x394   : > { %v334_v62 = vmul.f32 %v332_v61, %v321_v59 }
 0x396   : > { %v336_v63 = vadd.f32 %v335_v60, %v334_v62 }
 0x398   : > { %v529_v0 = vmul.f32 -1.442695, %v336_v63 }
 0x39a   : > { %608 = vpow2.f32 %v529_v0 }
 0x3a4   : > { %v609_v1 = vpop.eup %608 }
 0x3a5   : > { %v340_v2 = vadd.f32 1.0, %v609_v1 }
 0x3a7   : > { %610 = vrcp.f32 %v340_v2 }
 0x3b1   : > { %v611_v3 = vpop.eup %610 }
 0x3b2   : > { %v344_v4 = vsel %vm343_vm7, %v611_v3, 0.0 }
 0x3b3   : > { %345 = vadd.xlane.f32.xlu1 %v344_v4 }
 0x440   : > { %v346_v5 = vpop.xlane.xlu1 %345 }
 0x441   : > { %v347_v6 = vadd.f32 1e-08, %v346_v5 }
 0x443   : > { %612 = vrcp.f32 %v347_v6 }
 0x44d   : > { %v613_v8 = vpop.eup %612 }
 0x44e   : > { %v349_v9 = vmul.f32 %v613_v8, %v611_v3 }
 0x450   : > { %v360_v10 = vrot.slane %v349_v9, %v359_v7  ;;  %v353_v11 = vrot.slane %v349_v9, %v328_v55 }
 0x452   : > { %362 = vbcast.lane.b32.xlu0 %v360_v10, 256  ;;  %355 = vbcast.lane.b32.xlu1 %v353_v11, 256 }
 0x4c4   : > { %v363_v14 = vpop.permute.xlu0 %362  ;;  %v356_v15 = vpop.permute.xlu1 %355 }
 0x4c5   : > { %v365_v16 = vmul.f32 %v363_v14, %v307_v12  ;;  %v364_v17 = vmul.f32 %v356_v15, %v306_v13 }
 0x4c7   : > { %v374_v18 = vsel %vm366_vm8, %v365_v16, 0.0  ;;  %v367_v19 = vsel %vm366_vm8, %v364_v17, 0.0 }
 0x4c8   : > { %v375_v20 = vrot.slane %v374_v18, 4  ;;  %v368_v21 = vrot.slane %v367_v19, 4 }
 0x4ca   : > { %v376_v22 = vadd.f32 %v375_v20, %v374_v18  ;;  %v369_v23 = vadd.f32 %v368_v21, %v367_v19 }
 0x4cc   : > { %v377_v24 = vrot.slane %v376_v22, 2  ;;  %v370_v25 = vrot.slane %v369_v23, 2 }
 0x4ce   : > { %v378_v26 = vadd.f32 %v377_v24, %v376_v22  ;;  %v371_v27 = vadd.f32 %v370_v25, %v369_v23 }
 0x4d0   : > { %v379_v28 = vrot.slane %v378_v26, 1  ;;  %v372_v29 = vrot.slane %v371_v27, 1 }
 0x4d2   : > { %v380_v30 = vadd.f32 %v379_v28, %v378_v26  ;;  %v373_v31 = vadd.f32 %v372_v29, %v371_v27 }
 0x4d4   : > { %v381_v32 = vmul.f32 %v373_v31, %v373_v31  ;;  %v382_v33 = vmul.f32 %v380_v30, %v380_v30 }
 0x4d6   : > { %v386_v34 = vsel %vm385_vm9, %v382_v33, %v381_v32 }
 0x4d7   : > { %v389_v35 = vsel %vm388_vm10, %v386_v34, 0.0 }
 0x4d8   : > { %390 = vadd.xlane.f32.xlu0 %v389_v35 }
 0x565   : > { %v391_v36 = vpop.xlane.xlu0 %390 }
 0x566   : > { %614 = vrsqrt.f32 %v391_v36  ;;  %vm394_vm11 = vcmp.eq.f32.partialorder %v391_v36, inf  ;;  %v397_v39 = vand.u32 2147483648, %v391_v36  ;;  %vm396_vm12 = vcmp.eq.f32.partialorder %v391_v36, 0.0 }
 0x570   : > { %v615_v37 = vpop.eup %614 }
 0x571   : > { %v393_v38 = vmul.f32 %v615_v37, %v391_v36 }
 0x573   : > { %v395_v40 = vsel %vm394_vm11, %v391_v36, %v393_v38 }
 0x574   : > { %v398_v41 = vsel %vm396_vm12, %v397_v39, %v395_v40 }
 0x575   : > { %v399_v42 = vadd.f32 1e-08, %v398_v41 }
 0x577   : > { %v401_v43 = vrot.slane %v399_v42, 1  ;;  %616 = vrcp.f32 %v399_v42 }
 0x579   : > { %618 = vrcp.f32 %v401_v43 }
 0x581   : > { %v617_v44 = vpop.eup %616 }
 0x582   : > { %v405_v47 = vmul.f32 %v617_v44, %v373_v31 }
 0x583   : > { %v619_v45 = vpop.eup %618 }
 0x584   : > { %v407_v46 = vmul.f32 %v619_v45, %v380_v30 }
 0x586   : > { %v410_v48 = vrot.slane %v407_v46, 7 }
 0x588   : > { %v411_v49 = vsel %vm385_vm9, %v410_v48, %v405_v47 }
 0x589   : > { %413 = vst.msk [vmem:[#allocation10] sm:$0x3] %vm388_vm10, %v411_v49 }
 0x58a PF: > { %p860_p2 = scmp.eq.s32.totalorder %s514_s15, 1  ;;  %s730_s4 = smov [#allocation10]  }
 0x58b   : > { %s429_s5 = sshll.u32 %s730_s4, 4  ;;  %s430_s5 = int_to_ptr.vmem [resolvable:$true] %s429_s5 }
 0x58c   : > { %s663_s6 = scalar_lea.vmem %s430_s5, 32  ;;  %s669_s7 = scalar_lea.vmem %s430_s5, 64 }
 0x58d   : > { %p664_p5 = scmp.ne.s32.totalorder %s430_s5, %s663_s6  ;;  %p670_p10 = scmp.lt.s32.totalorder %s430_s5, %s430_s5 }
 0x58e   : > { %p671_p3 = scmp.lt.s32.totalorder %s669_s7, %s663_s6 }
 0x58f   : > { %p665_p7 = pnand %p664_p5, %p860_p2 }
 0x590   : > { %p672_p4 = por %p671_p3, %p670_p10 }
 0x591   : > { %p666_p9 = pneg %p665_p7 }
 0x593   : > { %p673_p11 = pnand %p672_p4, %p666_p9 }
 0x595   : > { %676 = shalt.err (!%p673_p11)
}
 0x596   : > { %s677_s9 = scalar_lea.hbm %s897_s3, 32 }
 0x597   : > { %p678_p12 = scmp.ne.s32.totalorder %s897_s3, %s677_s9  ;;  %p683_p6 = scmp.lt.u32.totalorder %s677_s9, %s897_s3 }
 0x599   : > { %p679_p13 = pnand %p678_p12, %p860_p2 }
 0x59b   : > { %p680_p0 = pneg %p679_p13 }
 0x59d   : > { %p685_p8 = pnand %p683_p6, %p680_p0 }
 0x59f   : > { %688 = shalt.err (!%p685_p8)
}
 0x5a0   : > { %552 = dma.vmem_to_hbm [thread:$0]  (%p860_p2), %s430_s5, 32, %s897_s3, [#allocation7]  }
 0x5a1 PF: > { %p571_p1 = scmp.ge.s32.totalorder %s723_s14, 2  ;;  %p572_p5 = scmp.eq.s32.totalorder %s515_s16, 1 }
 0x5a3   : > { %p563_p7 = pnand %p572_p5, %p571_p1 }
 0x5a5   : > { %710 = dma.done.wait (!%p563_p7), [#allocation7], 32  }
 0x5a6   : > { %712 = vsyncadd (!%p563_p7), [#allocation7], 4294967264  ;;  %s18_s14 = sadd.s32 1, %s723_s14   ;;  %s907_s12 = smov %s719_s13 }
 0x5a7   : > { %p15_p9 = scmp.ge.s32.totalorder %s18_s14, 4   ;;  %s908_s13 = smov %s910_s17 }
 0x5a9   :  { %17 = sbr.rel (!%p15_p9) target bundleno = 5 (0x5), region = 89 }
 0x5b0   :  { %447 = vsyncpa [#allocation6], 1 }
 0x5b1   :  { %449 = vsyncpa [#allocation6 + $0x1], 1 }
 0x5b2   :  { %450 = vsyncpa [#allocation7], 1 }
 0x5b3   :  { %452 = vsyncpa [#allocation7 + $0x1], 1 }
 0x5b4   :  { %453 = vsyncpa [#allocation8], 1 }
 0x5b5   :  { %455 = vsyncpa [#allocation8 + $0x1], 1 }

</bundles_post_ra>
